<compile_context>
chip_gen: v7x
topology: tpu7x:2x2x1
jax: 0.10.0
libtpu: 0.0.40
codegen_flags: <defaults>
</compile_context>

<pallas_src>
import functools

import jax
import jax.numpy as jnp
from jax.experimental import pallas as pl
from jax.experimental.pallas import tpu as pltpu


def _round_up(x, m):
    return ((x + m - 1) // m) * m


def _pow_static(x, gamma):
    """x ** gamma, using a VPU multiply chain when gamma is a small integer."""
    g = float(gamma)
    if g == int(g) and 0 <= int(g) <= 8:
        n = int(g)
        if n == 0:
            return jnp.ones_like(x)
        r = x
        for _ in range(n - 1):
            r = r * x
        return r
    return jnp.power(x, g)  # non-integer gamma: exp/log on EUP


def _sigmoid_focal_terms(x_t):
    """pt, 1-pt, log(pt) for pt = sigmoid(x_t); transcendentals on [T,1] only."""
    z = jnp.exp(-jnp.abs(x_t))                       # in (0, 1]
    inv = pl.reciprocal(1.0 + z, approx=False)
    pos = x_t >= 0.0
    pt = jnp.where(pos, inv, z * inv)                # sigmoid(x_t)
    one_minus_pt = jnp.where(pos, z * inv, inv)      # sigmoid(-x_t)
    log_pt = jnp.where(pos, 0.0, x_t) - jnp.log(1.0 + z)   # log sigmoid(x_t)
    return pt, one_minus_pt, log_pt


def _softmax_focal_terms(x, onehot):
    """pt, 1-pt, log(pt) for pt = softmax(x)[target]; no full softmax matrix."""
    m = jnp.max(x, axis=1, keepdims=True)
    ex = jnp.exp(x - m)
    sum_ex = jnp.sum(ex, axis=1, keepdims=True)
    ex_t = jnp.sum(ex * onehot, axis=1, keepdims=True)
    pt = ex_t * pl.reciprocal(sum_ex, approx=False)
    x_t = jnp.sum(x * onehot, axis=1, keepdims=True)
    log_pt = (x_t - m) - jnp.log(sum_ex)
    return pt, 1.0 - pt, log_pt


# ----------------------------- fused kernel ----------------------------------
def _total_loss_kernel(node_ref, obj_lbl_ref, obj_w_ref,
                       edge_ref, rel_lbl_ref, rel_w_ref,
                       obj_out_ref, pred_out_ref, tot_out_ref,
                       *, gamma, alpha, beta, n_nodes, n_edges, tile_rows):
    i = pl.program_id(0)

    @pl.when(i == 0)
    def _init_and_obj_branch():
        pred_out_ref[...] = jnp.zeros_like(pred_out_ref)

        # object branch (sigmoid focal loss), full tensor resident -> one shot
        x = node_ref[...].astype(jnp.float32)                    # [N, Co]
        t, c = x.shape
        cls_id = jax.lax.broadcasted_iota(jnp.int32, (t, c), 1)
        onehot = (cls_id == obj_lbl_ref[...]).astype(jnp.float32)
        x_t = jnp.sum(x * onehot, axis=1, keepdims=True)                  # [N,1]
        a_t = jnp.sum(obj_w_ref[...] * onehot, axis=1, keepdims=True)     # [N,1]
        _, one_minus_pt, log_pt = _sigmoid_focal_terms(x_t)
        loss = -a_t * _pow_static(one_minus_pt, gamma) * log_pt
        obj_out_ref[...] = jnp.sum(loss, keepdims=True)          # [1,1] sum

    # predicate branch (softmax focal loss), tiled over edge rows -------------
    xe = edge_ref[...].astype(jnp.float32)                        # [T, Cr]
    t, c = xe.shape
    cls_id = jax.lax.broadcasted_iota(jnp.int32, (t, c), 1)
    onehot = (cls_id == rel_lbl_ref[...]).astype(jnp.float32)
    a_t = jnp.sum(rel_w_ref[...] * onehot, axis=1, keepdims=True)
    _, one_minus_pt, log_pt = _softmax_focal_terms(xe, onehot)
    loss_e = -a_t * _pow_static(one_minus_pt, gamma) * log_pt     # [T, 1]

    # mask rows past the true extent (partial last tile -> padded garbage)
    rid = jax.lax.broadcasted_iota(jnp.int32, (t, 1), 0) + i * tile_rows
    loss_e = jnp.where(rid < n_edges, loss_e, 0.0)
    pred_out_ref[...] += jnp.sum(loss_e)

    @pl.when(i == pl.num_programs(0) - 1)
    def _finalize():
        obj_loss = obj_out_ref[...] * jnp.float32(1.0 / n_nodes)   # mean
        pred_loss = pred_out_ref[...] * jnp.float32(1.0 / n_edges)
        obj_out_ref[...] = obj_loss
        pred_out_ref[...] = pred_loss
        tot_out_ref[...] = (jnp.float32(alpha) * obj_loss
                            + jnp.float32(beta) * pred_loss)


def _total_loss_fused(node_output, edge_output, obj_lbl, rel_lbl,
                      obj_w, pred_w, *, alpha, beta, gamma, tile_rows):
    n, co = node_output.shape
    e, cr = edge_output.shape
    tile_rows = min(int(tile_rows), _round_up(e, 8))
    grid = (pl.cdiv(e, tile_rows),)

    kernel = functools.partial(
        _total_loss_kernel, gamma=float(gamma), alpha=float(alpha),
        beta=float(beta), n_nodes=n, n_edges=e, tile_rows=tile_rows)

    bytes_in = (n * co * node_output.dtype.itemsize + n * 4 + co * 4
                + e * cr * edge_output.dtype.itemsize + e * 4 + cr * 4)
    cost = pl.CostEstimate(
        flops=8 * (n * co + e * cr),
        transcendentals=2 * n + e * (cr + 2),
        bytes_accessed=bytes_in + 12)

    outs = pl.pallas_call(
        kernel,
        out_shape=(jax.ShapeDtypeStruct((1, 1), jnp.float32),
                   jax.ShapeDtypeStruct((1, 1), jnp.float32),
                   jax.ShapeDtypeStruct((1, 1), jnp.float32)),
        grid_spec=pltpu.PrefetchScalarGridSpec(
            num_scalar_prefetch=0,
            grid=grid,
            in_specs=[
                pl.BlockSpec((n, co), lambda i: (0, 0)),          # node logits (resident)
                pl.BlockSpec((n, 1), lambda i: (0, 0)),           # obj labels
                pl.BlockSpec((1, co), lambda i: (0, 0)),          # obj class weights
                pl.BlockSpec((tile_rows, cr), lambda i: (i, 0)),  # edge logits tile
                pl.BlockSpec((tile_rows, 1), lambda i: (i, 0)),   # rel labels tile
                pl.BlockSpec((1, cr), lambda i: (0, 0)),          # pred class weights
            ],
            out_specs=[
                pl.BlockSpec((1, 1), lambda i: (0, 0)),           # obj_loss
                pl.BlockSpec((1, 1), lambda i: (0, 0)),           # pred_loss
                pl.BlockSpec((1, 1), lambda i: (0, 0)),           # total
            ],
        ),
        compiler_params=pltpu.CompilerParams(
            dimension_semantics=("arbitrary",)),
        cost_estimate=cost,
    )(node_output,
      obj_lbl.reshape(n, 1).astype(jnp.int32),
      obj_w.reshape(1, co).astype(jnp.float32),
      edge_output,
      rel_lbl.reshape(e, 1).astype(jnp.int32),
      pred_w.reshape(1, cr).astype(jnp.float32))

    obj_loss = outs[0][0, 0]
    pred_loss = outs[1][0, 0]
    total = outs[2][0, 0]
    return obj_loss, pred_loss, total


# ----------------- fallback: per-branch tiled sum (large N) ------------------
def _focal_sum_kernel(logits_ref, labels_ref, alpha_ref, out_ref,
                      *, gamma, use_softmax, n_rows, tile_rows):
    i = pl.program_id(0)

    @pl.when(i == 0)
    def _():
        out_ref[...] = jnp.zeros_like(out_ref)

    x = logits_ref[...].astype(jnp.float32)                 # [T, C]
    labels = labels_ref[...]                                # [T, 1] int32
    t, c = x.shape
    cls_id = jax.lax.broadcasted_iota(jnp.int32, (t, c), 1)
    onehot = (cls_id == labels).astype(jnp.float32)
    a_t = jnp.sum(alpha_ref[...] * onehot, axis=1, keepdims=True)

    if use_softmax:
        _, one_minus_pt, log_pt = _softmax_focal_terms(x, onehot)
    else:
        x_t = jnp.sum(x * onehot, axis=1, keepdims=True)
        _, one_minus_pt, log_pt = _sigmoid_focal_terms(x_t)

    loss_i = -a_t * _pow_static(one_minus_pt, gamma) * log_pt
    rid = jax.lax.broadcasted_iota(jnp.int32, (t, 1), 0) + i * tile_rows
    loss_i = jnp.where(rid < n_rows, loss_i, 0.0)
    out_ref[...] += jnp.sum(loss_i)


def _focal_loss_sum(logits, labels, class_w, *, gamma, use_softmax,
                    tile_rows=2048):
    rows, c = logits.shape
    tile_rows = min(int(tile_rows), _round_up(rows, 8))
    grid = (pl.cdiv(rows, tile_rows),)

    kernel = functools.partial(
        _focal_sum_kernel, gamma=float(gamma), use_softmax=use_softmax,
        n_rows=rows, tile_rows=tile_rows)

    bytes_in = rows * c * logits.dtype.itemsize + rows * 4 + c * 4
    cost = pl.CostEstimate(
        flops=8 * rows * c,
        transcendentals=(rows * (c + 2)) if use_softmax else (2 * rows),
        bytes_accessed=bytes_in + 4)

    out = pl.pallas_call(
        kernel,
        out_shape=jax.ShapeDtypeStruct((1, 1), jnp.float32),
        grid_spec=pltpu.PrefetchScalarGridSpec(
            num_scalar_prefetch=0,
            grid=grid,
            in_specs=[
                pl.BlockSpec((tile_rows, c), lambda i: (i, 0)),
                pl.BlockSpec((tile_rows, 1), lambda i: (i, 0)),
                pl.BlockSpec((1, c), lambda i: (0, 0)),
            ],
            out_specs=pl.BlockSpec((1, 1), lambda i: (0, 0)),
        ),
        compiler_params=pltpu.CompilerParams(
            dimension_semantics=("arbitrary",)),
        cost_estimate=cost,
    )(logits,
      labels.reshape(rows, 1).astype(jnp.int32),
      class_w.reshape(1, c).astype(jnp.float32))
    return out[0, 0]


# ------------------------------- public API ----------------------------------
def total_loss(node_output, edge_output, gt_obj_cls, gt_rel_cls,
               obj_w, pred_w, *, alpha, beta, gamma, tile_rows=2048):
    """Returns (obj_loss, pred_loss, alpha * obj_loss + beta * pred_loss)."""
    n, co = node_output.shape
    e, _ = edge_output.shape

    # Accept either integer labels or a dense one-hot target; only int labels
    # are ever DMA'd into the kernel.
    if gt_rel_cls.ndim == 2:
        gt_rel_cls = jnp.argmax(gt_rel_cls, axis=1)
    if gt_obj_cls.ndim == 2:
        gt_obj_cls = jnp.argmax(gt_obj_cls, axis=1)

    node_bytes = n * co * node_output.dtype.itemsize
    if node_bytes <= (2 << 20):
        # typical scene-graph sizes: keep the node tensor resident and fuse
        # both branches into one pallas_call.
        return _total_loss_fused(node_output, edge_output, gt_obj_cls,
                                 gt_rel_cls, obj_w, pred_w,
                                 alpha=alpha, beta=beta, gamma=gamma,
                                 tile_rows=tile_rows)

    # very large node tensor: tile each branch separately.
    obj_sum = _focal_loss_sum(node_output, gt_obj_cls, obj_w,
                              gamma=gamma, use_softmax=False,
                              tile_rows=tile_rows)
    pred_sum = _focal_loss_sum(edge_output, gt_rel_cls, pred_w,
                               gamma=gamma, use_softmax=True,
                               tile_rows=tile_rows)
    obj_loss = obj_sum / jnp.float32(n)
    pred_loss = pred_sum / jnp.float32(e)
    return obj_loss, pred_loss, alpha * obj_loss + beta * pred_loss


# ----------------------------- pure-JAX reference ----------------------------
def total_loss_ref(node_output, edge_output, gt_obj_cls, gt_rel_cls,
                   obj_w, pred_w, *, alpha, beta, gamma):
    n, obj_num = node_output.shape
    e, rel_num = edge_output.shape
    x = node_output.astype(jnp.float32)
    onehot_o = jax.nn.one_hot(gt_obj_cls, obj_num, dtype=jnp.float32)
    p = jax.nn.sigmoid(x)
    pt = jnp.sum(p * onehot_o, axis=1)
    a_t = jnp.sum(obj_w[None, :] * onehot_o, axis=1)
    obj_loss = jnp.mean(-a_t * (1.0 - pt) ** gamma * jnp.log(pt))

    xe = edge_output.astype(jnp.float32)
    onehot_r = jax.nn.one_hot(gt_rel_cls, rel_num, dtype=jnp.float32)
    sm = jax.nn.softmax(xe, axis=1)
    pt_p = jnp.sum(sm * onehot_r, axis=1)
    a_p = jnp.sum(pred_w[None, :] * onehot_r, axis=1)
    pred_loss = jnp.mean(-a_p * (1.0 - pt_p) ** gamma * jnp.log(pt_p))
    return obj_loss, pred_loss, alpha * obj_loss + beta * pred_loss


if __name__ == "__main__":
    key = jax.random.PRNGKey(0)
    insnum, obj_num, rel_num = 8, 16, 8
    n_edges = insnum * insnum - insnum          # 56 directed edges

    k1, k2, k3, k4 = jax.random.split(key, 4)
    node_output = jax.random.normal(k1, (insnum, obj_num), jnp.float32)
    edge_output = jax.random.normal(k2, (n_edges, rel_num), jnp.float32)
    gt_obj_cls = jax.random.randint(k3, (insnum,), 0, obj_num, jnp.int32)
    gt_rel_cls = jax.random.randint(k4, (n_edges,), 0, rel_num, jnp.int32)

    # deterministic per-class weights (obj_w / pred_w from __init__)
    obj_w = jnp.linspace(0.5, 1.5, obj_num, dtype=jnp.float32)
    pred_w = jnp.linspace(0.5, 1.5, rel_num, dtype=jnp.float32)
    alpha, beta, gamma = 0.1, 1.0, 2.0

    out = total_loss(node_output, edge_output, gt_obj_cls, gt_rel_cls,
                     obj_w, pred_w, alpha=alpha, beta=beta, gamma=gamma)
    out = jax.block_until_ready(out)

    ref = total_loss_ref(node_output, edge_output, gt_obj_cls, gt_rel_cls,
                         obj_w, pred_w, alpha=alpha, beta=beta, gamma=gamma)
    for got, want in zip(out, ref):
        assert abs(float(got) - float(want)) < 1e-4, (float(got), float(want))

    print("KERNEL_OK")
</pallas_src>

<mosaic_0001>
module attributes {stable_mosaic.version = 11 : i64} {
  func.func @_total_loss_kernel(%arg0: i32, %arg1: memref<8x16xf32, #tpu.memory_space<vmem>>, %arg2: memref<8x1xi32, #tpu.memory_space<vmem>>, %arg3: memref<1x16xf32, #tpu.memory_space<vmem>>, %arg4: memref<56x8xf32, #tpu.memory_space<vmem>>, %arg5: memref<56x1xi32, #tpu.memory_space<vmem>>, %arg6: memref<1x8xf32, #tpu.memory_space<vmem>>, %arg7: memref<1x1xf32, #tpu.memory_space<vmem>>, %arg8: memref<1x1xf32, #tpu.memory_space<vmem>>, %arg9: memref<1x1xf32, #tpu.memory_space<vmem>>) attributes {dimension_semantics = [#tpu.dimension_semantics<arbitrary>], iteration_bounds = array<i64: 1>, scalar_prefetch = 0 : i64, scratch_operands = 0 : i64, tpu.core_type = #tpu.core_type<tc>, window_params = [{pipeline_mode = #tpu.pipeline_mode<synchronous>, transform_indices = @transform_0, window_bounds = array<i64: 8, 16>}, {pipeline_mode = #tpu.pipeline_mode<synchronous>, transform_indices = @transform_1, window_bounds = array<i64: 8, 1>}, {pipeline_mode = #tpu.pipeline_mode<synchronous>, transform_indices = @transform_2, window_bounds = array<i64: 1, 16>}, {transform_indices = @transform_3, window_bounds = array<i64: 56, 8>}, {transform_indices = @transform_4, window_bounds = array<i64: 56, 1>}, {pipeline_mode = #tpu.pipeline_mode<synchronous>, transform_indices = @transform_5, window_bounds = array<i64: 1, 8>}, {pipeline_mode = #tpu.pipeline_mode<synchronous>, transform_indices = @transform_6, window_bounds = array<i64: 1, 1>}, {pipeline_mode = #tpu.pipeline_mode<synchronous>, transform_indices = @transform_7, window_bounds = array<i64: 1, 1>}, {pipeline_mode = #tpu.pipeline_mode<synchronous>, transform_indices = @transform_8, window_bounds = array<i64: 1, 1>}]} {
    %c0_i32 = arith.constant 0 : i32
    %0 = arith.cmpi eq, %arg0, %c0_i32 : i32
    %1 = arith.extui %0 : i1 to i32
    %c0_i32_0 = arith.constant 0 : i32
    %2 = arith.cmpi ne, %1, %c0_i32_0 : i32
    scf.if %2 {
      %cst_21 = arith.constant 0.000000e+00 : f32
      %59 = vector.broadcast %cst_21 : f32 to vector<1x1xf32>
      %c0_22 = arith.constant 0 : index
      %c0_23 = arith.constant 0 : index
      %60 = vector.load %arg8[%c0_22, %c0_23] : memref<1x1xf32, #tpu.memory_space<vmem>>, vector<1x1xf32>
      tpu.vector_store %arg8[%c0_22, %c0_23], %59 {strides = array<i32>} : memref<1x1xf32, #tpu.memory_space<vmem>>, vector<1x1xf32>,
      %c0_24 = arith.constant 0 : index
      %c0_25 = arith.constant 0 : index
      %61 = vector.load %arg1[%c0_24, %c0_25] : memref<8x16xf32, #tpu.memory_space<vmem>>, vector<8x16xf32>
      %62 = tpu.iota {dimensions = array<i32: 1>} : vector<8x16xi32>
      %c0_26 = arith.constant 0 : index
      %c0_27 = arith.constant 0 : index
      %63 = vector.load %arg2[%c0_26, %c0_27] : memref<8x1xi32, #tpu.memory_space<vmem>>, vector<8x1xi32>
      %64 = vector.broadcast %63 : vector<8x1xi32> to vector<8x16xi32>
      %65 = arith.cmpi eq, %62, %64 : vector<8x16xi32>
      %66 = arith.extui %65 : vector<8x16xi1> to vector<8x16xi32>
      %67 = arith.sitofp %66 : vector<8x16xi32> to vector<8x16xf32>
      %68 = arith.mulf %61, %67 : vector<8x16xf32>
      %cst_28 = arith.constant dense<0.000000e+00> : vector<8xf32>
      %69 = vector.multi_reduction <add>, %68, %cst_28 [1] : vector<8x16xf32> to vector<8xf32>
      %70 = vector.shape_cast %69 : vector<8xf32> to vector<8x1xf32>
      %c0_29 = arith.constant 0 : index
      %c0_30 = arith.constant 0 : index
      %71 = vector.load %arg3[%c0_29, %c0_30] : memref<1x16xf32, #tpu.memory_space<vmem>>, vector<1x16xf32>
      %72 = vector.broadcast %71 : vector<1x16xf32> to vector<8x16xf32>
      %73 = arith.mulf %72, %67 : vector<8x16xf32>
      %cst_31 = arith.constant dense<0.000000e+00> : vector<8xf32>
      %74 = vector.multi_reduction <add>, %73, %cst_31 [1] : vector<8x16xf32> to vector<8xf32>
      %75 = vector.shape_cast %74 : vector<8xf32> to vector<8x1xf32>
      %76 = math.absf %70 : vector<8x1xf32>
      %cst_32 = arith.constant 0.000000e+00 : f32
      %77 = vector.broadcast %cst_32 : f32 to vector<8x1xf32>
      %78 = arith.subf %77, %76 : vector<8x1xf32>
      %79 = math.exp %78 : vector<8x1xf32>
      %cst_33 = arith.constant 1.000000e+00 : f32
      %80 = vector.broadcast %cst_33 : f32 to vector<8x1xf32>
      %81 = arith.addf %80, %79 : vector<8x1xf32>
      %82 = tpu.reciprocal %81 : vector<8x1xf32> -> vector<8x1xf32>
      %cst_34 = arith.constant 0.000000e+00 : f32
      %83 = vector.broadcast %cst_34 : f32 to vector<8x1xf32>
      %84 = arith.cmpf oge, %70, %83 : vector<8x1xf32>
      %85 = arith.mulf %79, %82 : vector<8x1xf32>
      %86 = arith.select %84, %85, %82 : vector<8x1xi1>, vector<8x1xf32>
      %cst_35 = arith.constant 0.000000e+00 : f32
      %87 = vector.broadcast %cst_35 : f32 to vector<8x1xf32>
      %88 = arith.select %84, %87, %70 : vector<8x1xi1>, vector<8x1xf32>
      %cst_36 = arith.constant 1.000000e+00 : f32
      %89 = vector.broadcast %cst_36 : f32 to vector<8x1xf32>
      %90 = arith.addf %89, %79 : vector<8x1xf32>
      %91 = math.log %90 : vector<8x1xf32>
      %92 = arith.subf %88, %91 : vector<8x1xf32>
      %cst_37 = arith.constant 0.000000e+00 : f32
      %93 = vector.broadcast %cst_37 : f32 to vector<8x1xf32>
      %94 = arith.subf %93, %75 : vector<8x1xf32>
      %95 = arith.mulf %86, %86 : vector<8x1xf32>
      %96 = arith.mulf %94, %95 : vector<8x1xf32>
      %97 = arith.mulf %96, %92 : vector<8x1xf32>
      %98 = vector.shape_cast %97 : vector<8x1xf32> to vector<1x8x1xf32>
      %cst_38 = arith.constant dense<0.000000e+00> : vector<1xf32>
      %99 = vector.multi_reduction <add>, %98, %cst_38 [1, 2] : vector<1x8x1xf32> to vector<1xf32>
      %100 = vector.shape_cast %99 : vector<1xf32> to vector<1x1x1xf32>
      %101 = vector.extract %100[0, 0, 0] : f32 from vector<1x1x1xf32>
      %102 = vector.broadcast %101 : f32 to vector<1x1xf32>
      %c0_39 = arith.constant 0 : index
      %c0_40 = arith.constant 0 : index
      %103 = vector.load %arg7[%c0_39, %c0_40] : memref<1x1xf32, #tpu.memory_space<vmem>>, vector<1x1xf32>
      tpu.vector_store %arg7[%c0_39, %c0_40], %102 {strides = array<i32>} : memref<1x1xf32, #tpu.memory_space<vmem>>, vector<1x1xf32>,
    } else {
    }
    %c0 = arith.constant 0 : index
    %c0_1 = arith.constant 0 : index
    %3 = vector.load %arg4[%c0, %c0_1] : memref<56x8xf32, #tpu.memory_space<vmem>>, vector<56x8xf32>
    %4 = tpu.iota {dimensions = array<i32: 1>} : vector<56x8xi32>
    %c0_2 = arith.constant 0 : index
    %c0_3 = arith.constant 0 : index
    %5 = vector.load %arg5[%c0_2, %c0_3] : memref<56x1xi32, #tpu.memory_space<vmem>>, vector<56x1xi32>
    %6 = vector.broadcast %5 : vector<56x1xi32> to vector<56x8xi32>
    %7 = arith.cmpi eq, %4, %6 : vector<56x8xi32>
    %8 = arith.extui %7 : vector<56x8xi1> to vector<56x8xi32>
    %9 = arith.sitofp %8 : vector<56x8xi32> to vector<56x8xf32>
    %c0_4 = arith.constant 0 : index
    %c0_5 = arith.constant 0 : index
    %10 = vector.load %arg6[%c0_4, %c0_5] : memref<1x8xf32, #tpu.memory_space<vmem>>, vector<1x8xf32>
    %11 = vector.broadcast %10 : vector<1x8xf32> to vector<56x8xf32>
    %12 = arith.mulf %11, %9 : vector<56x8xf32>
    %cst = arith.constant dense<0.000000e+00> : vector<56xf32>
    %13 = vector.multi_reduction <add>, %12, %cst [1] : vector<56x8xf32> to vector<56xf32>
    %14 = vector.shape_cast %13 : vector<56xf32> to vector<56x1xf32>
    %cst_6 = arith.constant dense<0xFF800000> : vector<56xf32>
    %15 = vector.multi_reduction <maximumf>, %3, %cst_6 [1] : vector<56x8xf32> to vector<56xf32>
    %16 = vector.shape_cast %15 : vector<56xf32> to vector<56x1xf32>
    %17 = vector.broadcast %16 : vector<56x1xf32> to vector<56x8xf32>
    %18 = arith.subf %3, %17 : vector<56x8xf32>
    %19 = math.exp %18 : vector<56x8xf32>
    %cst_7 = arith.constant dense<0.000000e+00> : vector<56xf32>
    %20 = vector.multi_reduction <add>, %19, %cst_7 [1] : vector<56x8xf32> to vector<56xf32>
    %21 = vector.shape_cast %20 : vector<56xf32> to vector<56x1xf32>
    %22 = arith.mulf %19, %9 : vector<56x8xf32>
    %cst_8 = arith.constant dense<0.000000e+00> : vector<56xf32>
    %23 = vector.multi_reduction <add>, %22, %cst_8 [1] : vector<56x8xf32> to vector<56xf32>
    %24 = vector.shape_cast %23 : vector<56xf32> to vector<56x1xf32>
    %25 = tpu.reciprocal %21 : vector<56x1xf32> -> vector<56x1xf32>
    %26 = arith.mulf %24, %25 : vector<56x1xf32>
    %27 = arith.mulf %3, %9 : vector<56x8xf32>
    %cst_9 = arith.constant dense<0.000000e+00> : vector<56xf32>
    %28 = vector.multi_reduction <add>, %27, %cst_9 [1] : vector<56x8xf32> to vector<56xf32>
    %29 = vector.shape_cast %28 : vector<56xf32> to vector<56x1xf32>
    %30 = arith.subf %29, %16 : vector<56x1xf32>
    %31 = math.log %21 : vector<56x1xf32>
    %32 = arith.subf %30, %31 : vector<56x1xf32>
    %cst_10 = arith.constant 1.000000e+00 : f32
    %33 = vector.broadcast %cst_10 : f32 to vector<56x1xf32>
    %34 = arith.subf %33, %26 : vector<56x1xf32>
    %cst_11 = arith.constant 0.000000e+00 : f32
    %35 = vector.broadcast %cst_11 : f32 to vector<56x1xf32>
    %36 = arith.subf %35, %14 : vector<56x1xf32>
    %37 = arith.mulf %34, %34 : vector<56x1xf32>
    %38 = arith.mulf %36, %37 : vector<56x1xf32>
    %39 = arith.mulf %38, %32 : vector<56x1xf32>
    %40 = tpu.iota {dimensions = array<i32: 0>} : vector<56x1xi32>
    %c56_i32 = arith.constant 56 : i32
    %41 = arith.muli %arg0, %c56_i32 : i32
    %42 = vector.broadcast %41 : i32 to vector<56x1xi32>
    %43 = arith.addi %40, %42 : vector<56x1xi32>
    %c56_i32_12 = arith.constant 56 : i32
    %44 = vector.broadcast %c56_i32_12 : i32 to vector<56x1xi32>
    %45 = arith.cmpi slt, %43, %44 : vector<56x1xi32>
    %cst_13 = arith.constant 0.000000e+00 : f32
    %46 = vector.broadcast %cst_13 : f32 to vector<56x1xf32>
    %47 = arith.select %45, %39, %46 : vector<56x1xi1>, vector<56x1xf32>
    %c0_14 = arith.constant 0 : index
    %c0_15 = arith.constant 0 : index
    %48 = vector.load %arg8[%c0_14, %c0_15] : memref<1x1xf32, #tpu.memory_space<vmem>>, vector<1x1xf32>
    %49 = vector.shape_cast %47 : vector<56x1xf32> to vector<1x56x1xf32>
    %cst_16 = arith.constant dense<0.000000e+00> : vector<1xf32>
    %50 = vector.multi_reduction <add>, %49, %cst_16 [1, 2] : vector<1x56x1xf32> to vector<1xf32>
    %51 = vector.shape_cast %50 : vector<1xf32> to vector<1x1x1xf32>
    %52 = vector.extract %51[0, 0, 0] : f32 from vector<1x1x1xf32>
    %53 = vector.broadcast %52 : f32 to vector<1x1xf32>
    %54 = arith.addf %48, %53 : vector<1x1xf32>
    %c0_17 = arith.constant 0 : index
    %c0_18 = arith.constant 0 : index
    %55 = vector.load %arg8[%c0_17, %c0_18] : memref<1x1xf32, #tpu.memory_space<vmem>>, vector<1x1xf32>
    tpu.vector_store %arg8[%c0_17, %c0_18], %54 {strides = array<i32>} : memref<1x1xf32, #tpu.memory_space<vmem>>, vector<1x1xf32>,
    %c0_i32_19 = arith.constant 0 : i32
    %56 = arith.cmpi eq, %arg0, %c0_i32_19 : i32
    %57 = arith.extui %56 : i1 to i32
    %c0_i32_20 = arith.constant 0 : i32
    %58 = arith.cmpi ne, %57, %c0_i32_20 : i32
    scf.if %58 {
      %c0_21 = arith.constant 0 : index
      %c0_22 = arith.constant 0 : index
      %59 = vector.load %arg7[%c0_21, %c0_22] : memref<1x1xf32, #tpu.memory_space<vmem>>, vector<1x1xf32>
      %cst_23 = arith.constant 1.250000e-01 : f32
      %60 = vector.broadcast %cst_23 : f32 to vector<1x1xf32>
      %61 = arith.mulf %59, %60 : vector<1x1xf32>
      %c0_24 = arith.constant 0 : index
      %c0_25 = arith.constant 0 : index
      %62 = vector.load %arg8[%c0_24, %c0_25] : memref<1x1xf32, #tpu.memory_space<vmem>>, vector<1x1xf32>
      %cst_26 = arith.constant 0.0178571437 : f32
      %63 = vector.broadcast %cst_26 : f32 to vector<1x1xf32>
      %64 = arith.mulf %62, %63 : vector<1x1xf32>
      %c0_27 = arith.constant 0 : index
      %c0_28 = arith.constant 0 : index
      %65 = vector.load %arg7[%c0_27, %c0_28] : memref<1x1xf32, #tpu.memory_space<vmem>>, vector<1x1xf32>
      tpu.vector_store %arg7[%c0_27, %c0_28], %61 {strides = array<i32>} : memref<1x1xf32, #tpu.memory_space<vmem>>, vector<1x1xf32>,
      %c0_29 = arith.constant 0 : index
      %c0_30 = arith.constant 0 : index
      %66 = vector.load %arg8[%c0_29, %c0_30] : memref<1x1xf32, #tpu.memory_space<vmem>>, vector<1x1xf32>
      tpu.vector_store %arg8[%c0_29, %c0_30], %64 {strides = array<i32>} : memref<1x1xf32, #tpu.memory_space<vmem>>, vector<1x1xf32>,
      %cst_31 = arith.constant 1.000000e-01 : f32
      %67 = vector.broadcast %cst_31 : f32 to vector<1x1xf32>
      %68 = arith.mulf %67, %61 : vector<1x1xf32>
      %cst_32 = arith.constant 1.000000e+00 : f32
      %69 = vector.broadcast %cst_32 : f32 to vector<1x1xf32>
      %70 = arith.mulf %69, %64 : vector<1x1xf32>
      %71 = arith.addf %68, %70 : vector<1x1xf32>
      %c0_33 = arith.constant 0 : index
      %c0_34 = arith.constant 0 : index
      %72 = vector.load %arg9[%c0_33, %c0_34] : memref<1x1xf32, #tpu.memory_space<vmem>>, vector<1x1xf32>
      tpu.vector_store %arg9[%c0_33, %c0_34], %71 {strides = array<i32>} : memref<1x1xf32, #tpu.memory_space<vmem>>, vector<1x1xf32>,
    } else {
    }
    return
  }
  func.func @transform_0(%arg0: i32) -> (i32, i32) {
    %c0_i32 = arith.constant 0 : i32
    %c0_i32_0 = arith.constant 0 : i32
    %c0_i32_1 = arith.constant 0 : i32
    return %c0_i32, %c0_i32_0 : i32, i32
  }
  func.func @transform_1(%arg0: i32) -> (i32, i32) {
    %c0_i32 = arith.constant 0 : i32
    %c0_i32_0 = arith.constant 0 : i32
    %c0_i32_1 = arith.constant 0 : i32
    return %c0_i32, %c0_i32_0 : i32, i32
  }
  func.func @transform_2(%arg0: i32) -> (i32, i32) {
    %c0_i32 = arith.constant 0 : i32
    %c0_i32_0 = arith.constant 0 : i32
    %c0_i32_1 = arith.constant 0 : i32
    return %c0_i32, %c0_i32_0 : i32, i32
  }
  func.func @transform_3(%arg0: i32) -> (i32, i32) {
    %c0_i32 = arith.constant 0 : i32
    %c0_i32_0 = arith.constant 0 : i32
    return %arg0, %c0_i32 : i32, i32
  }
  func.func @transform_4(%arg0: i32) -> (i32, i32) {
    %c0_i32 = arith.constant 0 : i32
    %c0_i32_0 = arith.constant 0 : i32
    return %arg0, %c0_i32 : i32, i32
  }
  func.func @transform_5(%arg0: i32) -> (i32, i32) {
    %c0_i32 = arith.constant 0 : i32
    %c0_i32_0 = arith.constant 0 : i32
    %c0_i32_1 = arith.constant 0 : i32
    return %c0_i32, %c0_i32_0 : i32, i32
  }
  func.func @transform_6(%arg0: i32) -> (i32, i32) {
    %c0_i32 = arith.constant 0 : i32
    %c0_i32_0 = arith.constant 0 : i32
    %c0_i32_1 = arith.constant 0 : i32
    return %c0_i32, %c0_i32_0 : i32, i32
  }
  func.func @transform_7(%arg0: i32) -> (i32, i32) {
    %c0_i32 = arith.constant 0 : i32
    %c0_i32_0 = arith.constant 0 : i32
    %c0_i32_1 = arith.constant 0 : i32
    return %c0_i32, %c0_i32_0 : i32, i32
  }
  func.func @transform_8(%arg0: i32) -> (i32, i32) {
    %c0_i32 = arith.constant 0 : i32
    %c0_i32_0 = arith.constant 0 : i32
    %c0_i32_1 = arith.constant 0 : i32
    return %c0_i32, %c0_i32_0 : i32, i32
  }
}

</mosaic_0001>

<bundles_post_ra>
// kernel: tpu_custom_call.1
= control target key start
LH: loop header
LB: loop body
LE: loop exit
PB: predicated region body
PF: predicated region fallthrough
CT: control target
= control target key end

     0   :  { %14 = vsyncpa [#allocation3], 0  ;;  %vm162_vm0 = vcmask 64512   ;;  %v631_v6 = vmov 0   ;;  %s1001_s0 = inlined_call_operand.vmem [shape: f32[8,16], index: 0, kind: input, shape index: {}]   ;;  %s1002_s1 = inlined_call_operand.vmem [shape: s32[8,1], index: 1, kind: input, shape index: {}]   ;;  %s1003_s2 = inlined_call_operand.vmem [shape: f32[1,16], index: 2, kind: input, shape index: {}]   ;;  %s1004_s3 = inlined_call_operand.vmem [shape: f32[56,8], index: 3, kind: input, shape index: {}]   ;;  %s1005_s4 = inlined_call_operand.vmem [shape: s32[56,1], index: 4, kind: input, shape index: {}]   ;;  %s1006_s5 = inlined_call_operand.vmem [shape: f32[1,8], index: 5, kind: input, shape index: {}]   ;;  %s1007_s6 = inlined_call_operand.hbm [shape: f32[1,1], index: 6, kind: output, shape index: {0}]   ;;  %s1008_s7 = inlined_call_operand.hbm [shape: f32[1,1], index: 7, kind: output, shape index: {1}]   ;;  %s1009_s8 = inlined_call_operand.hbm [shape: f32[1,1], index: 8, kind: output, shape index: {2}]  }
   0x1   :  { %v684_v0 = vld [vmem:[%s1004_s3 + $0x10] sm:$0xff]  ;;  %v689_v1 = vld [vmem:[%s1004_s3] sm:$0xff]  ;;  %v694_v2 = vld [vmem:[%s1004_s3 + $0x18] sm:$0xff]  ;;  %511 = vset.pattern.permute.xlu1 %v631_v6  ;;  %512 = vset.pattern.permute.xlu0 %v631_v6 }
   0x2   :  { %v190_v3 = vsel %vm162_vm0, %v684_v0, -inf  ;;  %v184_v4 = vsel %vm162_vm0, %v689_v1, -inf  ;;  %v703_v5 = vld [vmem:[%s1004_s3 + $0x8] sm:$0xff]  ;;  %v193_v7 = vsel %vm162_vm0, %v694_v2, -inf  ;;  %v717_v10 = vld [vmem:[%s1004_s3 + $0x20] sm:$0xff] }
   0x3   :  { %191 = vmax.xlane.f32.xlu1 %v190_v3  ;;  %185 = vmax.xlane.f32.xlu0 %v184_v4  ;;  %v187_v8 = vsel %vm162_vm0, %v703_v5, -inf  ;;  %v712_v9 = vld [vmem:[%s1004_s3 + $0x28] sm:$0xff] }
   0x4   :  { %15 = vsyncpa [#allocation5], 0  ;;  %v199_v11 = vsel %vm162_vm0, %v712_v9, -inf  ;;  %v196_v12 = vsel %vm162_vm0, %v717_v10, -inf  ;;  %v726_v13 = vld [vmem:[%s1004_s3 + $0x30] sm:$0xff]  ;;  %v37_v15 = vld [vmem:[%s1002_s1] sm:$0xff]  ;;  %v35_v27 = vlaneseq }
   0x5   :  { %v202_v14 = vsel %vm162_vm0, %v726_v13, -inf  ;;  %v100_v16 = vld [vmem:[%s1005_s4 + $0x8] sm:$0xff]  ;;  %v101_v17 = vld [vmem:[%s1005_s4 + $0x10] sm:$0xff]  ;;  %v99_v18 = vld [vmem:[%s1005_s4] sm:$0xff]  ;;  %v632_v34 = vmov 0.0   ;;  %vm45_vm2 = vcmask 130048  }
   0x6   :  { %v102_v19 = vld [vmem:[%s1005_s4 + $0x18] sm:$0xff]  ;;  %v103_v20 = vld [vmem:[%s1005_s4 + $0x20] sm:$0xff]  ;;  %v104_v21 = vld [vmem:[%s1005_s4 + $0x28] sm:$0xff]  ;;  %v764_v29 = vand.u32 127, %v35_v27  ;;  %vm77_vm10 = vcmask 7168   ;;  %vm32_vm12 = vcmask 0  }
   0x7   :  { %194 = vmax.xlane.f32.xlu1 %v193_v7  ;;  %188 = vmax.xlane.f32.xlu0 %v187_v8  ;;  %v105_v22 = vld [vmem:[%s1005_s4 + $0x30] sm:$0xff]  ;;  %v34_v32 = vld [vmem:[%s1001_s0] sm:$0xff]  ;;  %33 = vst.msk [vmem:[#allocation4] sm:$0x1] %vm32_vm12, %v632_v34  ;;  %s634_s17 = smov [#allocation4]   ;;  %s635_s19 = smov [#allocation6]  }
   0x8   :  { %v493_v33 = vld [vmem:[%s1003_s2] ss:$0 sm:$0xff]  ;;  %s467_s18 = sshll.u32 %s634_s17, 4  ;;  %s477_s20 = sshll.u32 %s635_s19, 4  ;;  %s946_s18 = int_to_ptr.vmem [resolvable:$true] %s467_s18  ;;  %s962_s20 = int_to_ptr.vmem [resolvable:$true] %s477_s20 }
   0x9   :  { %v781_v40 = vld [vmem:[%s1006_s5] ss:$0 sm:$0xff]  ;;  %s633_s5 = smov [#allocation2]  }
   0xa   :  { %s457_s16 = sshll.u32 %s633_s5, 4  ;;  %s458_s16 = int_to_ptr.vmem [resolvable:$true] %s457_s16 }
   0xb   :  { %200 = vmax.xlane.f32.xlu1 %v199_v11  ;;  %197 = vmax.xlane.f32.xlu0 %v196_v12  ;;  %s561_s21 = scalar_lea.vmem %s458_s16, 16  ;;  %s565_s22 = scalar_lea.vmem %s458_s16, 32 }
   0xc   :  { %p562_p0 = scmp.ne.s32.totalorder %s458_s16, %s561_s21  ;;  %p566_p1 = scmp.lt.s32.totalorder %s458_s16, %s458_s16 }
   0xd   :  { %p567_p2 = scmp.lt.s32.totalorder %s565_s22, %s561_s21 }
   0xf   :  { %203 = vmax.xlane.f32.xlu0 %v202_v14  ;;  %p568_p3 = por %p567_p2, %p566_p1 }
  0x11   :  { %p569_p4 = pnand %p568_p3, %p562_p0 }
  0x1c   :  { %39 = vperm.xlu1 %511, %v37_v15  }
  0x20   :  { %110 = vperm.xlu1 %511, %v100_v16  }
  0x24   :  { %113 = vperm.xlu1 %511, %v101_v17  }
  0x25   :  { %107 = vperm.xlu0 %512, %v99_v18  }
  0x28   :  { %116 = vperm.xlu1 %511, %v102_v19  }
  0x2c   :  { %119 = vperm.xlu1 %511, %v103_v20  }
  0x30   :  { %122 = vperm.xlu1 %511, %v104_v21  }
  0x34   :  { %125 = vperm.xlu1 %511, %v105_v22  }
  0x90   :  { %v754_v23 = vpop.xlane.xlu1 %191  ;;  %v756_v24 = vpop.xlane.xlu0 %185 }
  0x91   :  { %v205_v50 = vsub.f32 %v689_v1, %v756_v24  ;;  %v207_v60 = vsub.f32 %v684_v0, %v754_v23 }
  0x93   :  { %v212_v61 = vmul.f32 1.442695, %v205_v50  ;;  %v216_v8 = vmul.f32 1.442695, %v207_v60 }
  0x94   :  { %v758_v25 = vpop.xlane.xlu1 %194  ;;  %v760_v26 = vpop.xlane.xlu0 %188 }
  0x95   :  { %v206_v53 = vsub.f32 %v703_v5, %v760_v26  ;;  %v208_v62 = vsub.f32 %v694_v2, %v758_v25  ;;  %513 = vpow2.f32 %v212_v61 }
  0x97   :  { %v214_v63 = vmul.f32 1.442695, %v206_v53 }
  0x98   :  { %v762_v28 = vpop.xlane.xlu1 %200  ;;  %v766_v30 = vpop.xlane.xlu0 %197 }
  0x99   :  { %v210_v11 = vsub.f32 %v712_v9, %v762_v28  ;;  %515 = vpow2.f32 %v214_v63  ;;  %v209_v12 = vsub.f32 %v717_v10, %v766_v30 }
  0x9a   :  { %517 = vpow2.f32 %v216_v8 }
  0x9b   :  { %v222_v20 = vmul.f32 1.442695, %v210_v11  ;;  %v220_v21 = vmul.f32 1.442695, %v209_v12 }
  0x9c   :  { %v40_v31 = vpop.permute.xlu1 %39  ;;  %v776_v38 = vpop.xlane.xlu0 %203 }
  0x9d   :  { %vm41_vm1 = vcmp.eq.s32.totalorder %v764_v29, %v40_v31  ;;  %v211_v22 = vsub.f32 %v726_v13, %v776_v38 }
  0x9e   :  { %v492_v35 = vsel %vm41_vm1, 1.0, %v632_v34 }
  0x9f   :  { %v44_v36 = vmul.f32 %v492_v35, %v34_v32  ;;  %v56_v37 = vmul.f32 %v493_v33, %v492_v35  ;;  %v224_v33 = vmul.f32 1.442695, %v211_v22  ;;  %v514_v35 = vpop.eup %513 }
  0xa0   :  { %v111_v39 = vpop.permute.xlu1 %110 }
  0xa1   :  { %vm128_vm3 = vcmp.eq.s32.totalorder %v764_v29, %v111_v39  ;;  %v46_v41 = vsel %vm45_vm2, %v44_v36, 0.0  ;;  %v787_v43 = vsel %vm45_vm2, %v56_v37, 0.0 }
  0xa2   :  { %v785_v42 = vsel %vm128_vm3, 1.0, %v632_v34  ;;  %47 = vadd.xlane.f32.xlu1 %v46_v41 }
  0xa3   :  { %v156_v44 = vmul.f32 %v781_v40, %v785_v42  ;;  %v290_v55 = vmul.f32 %v785_v42, %v703_v5  ;;  %v516_v39 = vpop.eup %515 }
  0xa4   :  { %v108_v45 = vpop.permute.xlu0 %107  ;;  %v114_v46 = vpop.permute.xlu1 %113 }
  0xa5   :  { %vm127_vm4 = vcmp.eq.s32.totalorder %v764_v29, %v108_v45  ;;  %vm129_vm5 = vcmp.eq.s32.totalorder %v764_v29, %v114_v46  ;;  %v166_v47 = vsel %vm162_vm0, %v156_v44, 0.0  ;;  %v299_v4 = vsel %vm162_vm0, %v290_v55, 0.0  ;;  %v518_v41 = vpop.eup %517 }
  0xa6   :  { %v795_v48 = vsel %vm127_vm4, 1.0, %v632_v34  ;;  %v798_v49 = vsel %vm129_vm5, 1.0, %v632_v34  ;;  %167 = vadd.xlane.f32.xlu1 %v166_v47  ;;  %v226_v44 = vsel %vm162_vm0, %v514_v35, 0.0  ;;  %v229_v45 = vsel %vm162_vm0, %v516_v39, 0.0 }
  0xa7   :  { %v155_v51 = vmul.f32 %v781_v40, %v795_v48  ;;  %v289_v52 = vmul.f32 %v795_v48, %v689_v1  ;;  %v157_v58 = vmul.f32 %v781_v40, %v798_v49  ;;  %v291_v3 = vmul.f32 %v798_v49, %v684_v0 }
  0xa8   :  { %v117_v54 = vpop.permute.xlu1 %116  ;;  %v218_v0 = vmul.f32 1.442695, %v208_v62  ;;  %v232_v47 = vsel %vm162_vm0, %v518_v41, 0.0  ;;  %v249_v60 = vmul.f32 %v518_v41, %v798_v49 }
  0xa9   :  { %vm130_vm6 = vcmp.eq.s32.totalorder %v764_v29, %v117_v54  ;;  %v163_v56 = vsel %vm162_vm0, %v155_v51, 0.0  ;;  %v296_v57 = vsel %vm162_vm0, %v289_v52, 0.0  ;;  %v169_v5 = vsel %vm162_vm0, %v157_v58, 0.0 }
  0xaa   :  { %v816_v59 = vsel %vm130_vm6, 1.0, %v632_v34  ;;  %164 = vadd.xlane.f32.xlu0 %v163_v56  ;;  %297 = vadd.xlane.f32.xlu1 %v296_v57  ;;  %v302_v15 = vsel %vm162_vm0, %v291_v3, 0.0  ;;  %519 = vpow2.f32 %v218_v0  ;;  %v247_v54 = vmul.f32 %v514_v35, %v795_v48 }
  0xab   :  { %v158_v6 = vmul.f32 %v781_v40, %v816_v59  ;;  %v292_v17 = vmul.f32 %v816_v59, %v694_v2  ;;  %521 = vpow2.f32 %v222_v20  ;;  %v248_v58 = vmul.f32 %v516_v39, %v785_v42 }
  0xac   :  { %v120_v1 = vpop.permute.xlu1 %119  ;;  %523 = vpow2.f32 %v220_v21  ;;  %v254_v57 = vsel %vm162_vm0, %v247_v54, 0.0  ;;  %v260_v63 = vsel %vm162_vm0, %v249_v60, 0.0 }
  0xad   :  { %vm131_vm7 = vcmp.eq.s32.totalorder %v764_v29, %v120_v1  ;;  %v172_v16 = vsel %vm162_vm0, %v158_v6, 0.0  ;;  %v305_v27 = vsel %vm162_vm0, %v292_v17, 0.0  ;;  %525 = vpow2.f32 %v224_v33 }
  0xae   :  { %v830_v7 = vsel %vm131_vm7, 1.0, %v632_v34  ;;  %300 = vadd.xlane.f32.xlu0 %v299_v4  ;;  %170 = vadd.xlane.f32.xlu1 %v169_v5  ;;  %v257_v62 = vsel %vm162_vm0, %v248_v58, 0.0 }
  0xaf   :  { %v159_v18 = vmul.f32 %v781_v40, %v830_v7  ;;  %v293_v32 = vmul.f32 %v830_v7, %v717_v10 }
  0xb0   :  { %v123_v14 = vpop.permute.xlu1 %122 }
  0xb1   :  { %vm132_vm8 = vcmp.eq.s32.totalorder %v764_v29, %v123_v14  ;;  %v175_v31 = vsel %vm162_vm0, %v159_v18, 0.0  ;;  %v308_v37 = vsel %vm162_vm0, %v293_v32, 0.0 }
  0xb2   :  { %v499_v19 = vsel %vm132_vm8, 1.0, %v632_v34  ;;  %173 = vadd.xlane.f32.xlu0 %v172_v16  ;;  %303 = vadd.xlane.f32.xlu1 %v302_v15 }
  0xb3   :  { %v160_v2 = vmul.f32 %v781_v40, %v499_v19  ;;  %v294_v4 = vmul.f32 %v499_v19, %v712_v9 }
  0xb4   :  { %v520_v10 = vpop.eup %519  ;;  %v126_v61 = vpop.permute.xlu1 %125 }
  0xb5   :  { %v178_v36 = vsel %vm162_vm0, %v160_v2, 0.0  ;;  %v522_v46 = vpop.eup %521  ;;  %v235_v50 = vsel %vm162_vm0, %v520_v10, 0.0  ;;  %v250_v48 = vmul.f32 %v520_v10, %v816_v59  ;;  %vm133_vm9 = vcmp.eq.s32.totalorder %v764_v29, %v126_v61 }
  0xb6   :  { %306 = vadd.xlane.f32.xlu0 %v305_v27  ;;  %176 = vadd.xlane.f32.xlu1 %v175_v31  ;;  %v524_v51 = vpop.eup %523  ;;  %v241_v53 = vsel %vm162_vm0, %v522_v46, 0.0  ;;  %v252_v1 = vmul.f32 %v522_v46, %v499_v19  ;;  %v500_v5 = vsel %vm133_vm9, 1.0, %v632_v34  ;;  %v311_v59 = vsel %vm162_vm0, %v294_v4, 0.0 }
  0xb7   :  { %v238_v52 = vsel %vm162_vm0, %v524_v51, 0.0  ;;  %v526_v55 = vpop.eup %525  ;;  %v263_v3 = vsel %vm162_vm0, %v250_v48, 0.0  ;;  %v251_v49 = vmul.f32 %v524_v51, %v830_v7  ;;  %v295_v11 = vmul.f32 %v500_v5, %v726_v13 }
  0xb8   :  { %v244_v56 = vsel %vm162_vm0, %v526_v55, 0.0  ;;  %v269_v42 = vsel %vm162_vm0, %v252_v1, 0.0  ;;  %v253_v8 = vmul.f32 %v526_v55, %v500_v5  ;;  %v161_v7 = vmul.f32 %v781_v40, %v500_v5 }
  0xb9   :  { %v266_v6 = vsel %vm162_vm0, %v251_v49, 0.0  ;;  %v314_v0 = vsel %vm162_vm0, %v295_v11, 0.0 }
  0xba   :  { %179 = vadd.xlane.f32.xlu0 %v178_v36  ;;  %309 = vadd.xlane.f32.xlu1 %v308_v37  ;;  %v272_v29 = vsel %vm162_vm0, %v253_v8, 0.0  ;;  %v181_v9 = vsel %vm162_vm0, %v161_v7, 0.0 }
  0xbe   :  { %227 = vadd.xlane.f32.xlu0 %v226_v44  ;;  %230 = vadd.xlane.f32.xlu1 %v229_v45 }
  0xc2   :  { %233 = vadd.xlane.f32.xlu0 %v232_v47  ;;  %236 = vadd.xlane.f32.xlu1 %v235_v50 }
  0xc6   :  { %239 = vadd.xlane.f32.xlu0 %v238_v52  ;;  %242 = vadd.xlane.f32.xlu1 %v241_v53 }
  0xca   :  { %245 = vadd.xlane.f32.xlu0 %v244_v56  ;;  %255 = vadd.xlane.f32.xlu1 %v254_v57 }
  0xce   :  { %258 = vadd.xlane.f32.xlu0 %v257_v62  ;;  %261 = vadd.xlane.f32.xlu1 %v260_v63 }
  0xd2   :  { %264 = vadd.xlane.f32.xlu0 %v263_v3  ;;  %270 = vadd.xlane.f32.xlu1 %v269_v42 }
  0xd6   :  { %267 = vadd.xlane.f32.xlu0 %v266_v6  ;;  %312 = vadd.xlane.f32.xlu1 %v311_v59 }
  0xda   :  { %273 = vadd.xlane.f32.xlu0 %v272_v29  ;;  %315 = vadd.xlane.f32.xlu1 %v314_v0 }
  0xde   :  { %182 = vadd.xlane.f32.xlu0 %v181_v9 }
  0xe2   :  { %58 = vadd.xlane.f32.xlu0 %v787_v43 }
 0x12f   :  { %v881_v12 = vpop.xlane.xlu1 %47 }
 0x130   :  { %v60_v40 = vand.u32 2147483647, %v881_v12  ;;  %vm66_vm11 = vcmp.ge.f32.partialorder %v881_v12, 0.0 }
 0x132   :  { %v61_v20 = vsub.f32 0.0, %v60_v40 }
 0x133   :  { %v883_v14 = vpop.xlane.xlu1 %167 }
 0x134   :  { %v62_v22 = vmul.f32 1.442695, %v61_v20  ;;  %v353_v55 = vsub.f32 0.0, %v883_v14 }
 0x136   :  { %527 = vpow2.f32 %v62_v22 }
 0x137   :  { %v885_v13 = vpop.xlane.xlu0 %164  ;;  %v887_v15 = vpop.xlane.xlu1 %297 }
 0x138   :  { %v352_v56 = vsub.f32 0.0, %v885_v13  ;;  %v317_v57 = vsub.f32 %v887_v15, %v756_v24 }
 0x13b   :  { %v889_v16 = vpop.xlane.xlu0 %300  ;;  %v891_v17 = vpop.xlane.xlu1 %170 }
 0x13c   :  { %v318_v48 = vsub.f32 %v889_v16, %v760_v26  ;;  %v354_v1 = vsub.f32 0.0, %v891_v17 }
 0x13f   :  { %v894_v18 = vpop.xlane.xlu0 %173  ;;  %v896_v19 = vpop.xlane.xlu1 %303 }
 0x140   :  { %v906_v39 = vpop.eup %527  ;;  %v355_v59 = vsub.f32 0.0, %v894_v18  ;;  %v319_v8 = vsub.f32 %v896_v19, %v754_v23 }
 0x141   :  { %v64_v45 = vadd.f32 1.0, %v906_v39 }
 0x143   :  { %v898_v43 = vpop.xlane.xlu0 %306  ;;  %v900_v21 = vpop.xlane.xlu1 %176 }
 0x144   :  { %v320_v11 = vsub.f32 %v898_v43, %v758_v25  ;;  %v356_v9 = vsub.f32 0.0, %v900_v21 }
 0x147   :  { %v902_v27 = vpop.xlane.xlu0 %179  ;;  %v904_v31 = vpop.xlane.xlu1 %309 }
 0x148   :  { %v357_v16 = vsub.f32 0.0, %v902_v27 }
 0x14b   :  { %v228_v2 = vpop.xlane.xlu0 %227  ;;  %v231_v32 = vpop.xlane.xlu1 %230 }
 0x14c   :  { %529 = vrcp.f32 %v228_v2 }
 0x14d   :  { %531 = vlog2.f32 %v228_v2 }
 0x14e   :  { %533 = vrcp.f32 %v231_v32 }
 0x14f   :  { %535 = vlog2.f32 %v231_v32  ;;  %v234_v33 = vpop.xlane.xlu0 %233  ;;  %v237_v35 = vpop.xlane.xlu1 %236 }
 0x150   :  { %537 = vrcp.f32 %v234_v33 }
 0x151   :  { %539 = vlog2.f32 %v234_v33 }
 0x152   :  { %541 = vrcp.f32 %v237_v35 }
 0x153   :  { %v240_v36 = vpop.xlane.xlu0 %239  ;;  %v243_v37 = vpop.xlane.xlu1 %242  ;;  %543 = vlog2.f32 %v237_v35 }
 0x154   :  { %545 = vrcp.f32 %v243_v37 }
 0x155   :  { %547 = vrcp.f32 %v240_v36 }
 0x156   :  { %v530_v41 = vpop.eup %529  ;;  %549 = vlog2.f32 %v243_v37  ;;  %v321_v37 = vsub.f32 %v904_v31, %v766_v30 }
 0x157   :  { %v532_v44 = vpop.eup %531  ;;  %v246_v10 = vpop.xlane.xlu0 %245  ;;  %551 = vlog2.f32 %v240_v36 }
 0x158   :  { %v256_v46 = vpop.xlane.xlu1 %255  ;;  %v534_v47 = vpop.eup %533  ;;  %553 = vrcp.f32 %v64_v45  ;;  %v325_v61 = vmul.f32 0.6931472, %v532_v44 }
 0x159   :  { %v282_v50 = vmul.f32 %v530_v41, %v256_v46  ;;  %v536_v51 = vpop.eup %535  ;;  %555 = vrcp.f32 %v246_v10 }
 0x15a   :  { %v538_v52 = vpop.eup %537  ;;  %557 = vlog2.f32 %v246_v10  ;;  %v327_v49 = vmul.f32 0.6931472, %v536_v51  ;;  %v338_v14 = vsub.f32 %v317_v57, %v325_v61 }
 0x15b   :  { %v345_v53 = vsub.f32 1.0, %v282_v50  ;;  %v540_v54 = vpop.eup %539  ;;  %v259_v58 = vpop.xlane.xlu0 %258  ;;  %559 = vlog2.f32 %v64_v45 }
 0x15c   :  { %v262_v60 = vpop.xlane.xlu1 %261  ;;  %v283_v63 = vmul.f32 %v534_v47, %v259_v58  ;;  %v542_v42 = vpop.eup %541  ;;  %v329_v4 = vmul.f32 0.6931472, %v540_v54  ;;  %v339_v23 = vsub.f32 %v318_v48, %v327_v49 }
 0x15d   :  { %v359_v62 = vmul.f32 %v345_v53, %v345_v53  ;;  %v284_v3 = vmul.f32 %v538_v52, %v262_v60  ;;  %v544_v24 = vpop.eup %543 }
 0x15e   :  { %v346_v6 = vsub.f32 1.0, %v283_v63  ;;  %v546_v7 = vpop.eup %545  ;;  %v340_v19 = vsub.f32 %v319_v8, %v329_v4  ;;  %v331_v2 = vmul.f32 0.6931472, %v544_v24 }
 0x15f   :  { %v366_v5 = vmul.f32 %v359_v62, %v352_v56  ;;  %v347_v29 = vsub.f32 1.0, %v284_v3  ;;  %v265_v26 = vpop.xlane.xlu0 %264  ;;  %v548_v15 = vpop.eup %547 }
 0x160   :  { %v271_v0 = vpop.xlane.xlu1 %270  ;;  %v360_v13 = vmul.f32 %v346_v6, %v346_v6  ;;  %v285_v40 = vmul.f32 %v542_v42, %v265_v26  ;;  %v550_v20 = vpop.eup %549  ;;  %v341_v57 = vsub.f32 %v320_v11, %v331_v2 }
 0x161   :  { %v361_v17 = vmul.f32 %v347_v29, %v347_v29  ;;  %v287_v18 = vmul.f32 %v546_v7, %v271_v0  ;;  %v373_v22 = vmul.f32 %v366_v5, %v338_v14  ;;  %v552_v43 = vpop.eup %551  ;;  %v335_v50 = vmul.f32 0.6931472, %v550_v20 }
 0x162   :  { %v367_v25 = vmul.f32 %v360_v13, %v353_v55  ;;  %v348_v33 = vsub.f32 1.0, %v285_v40  ;;  %v554_v45 = vpop.eup %553  ;;  %v333_v52 = vmul.f32 0.6931472, %v552_v43 }
 0x163   :  { %v368_v32 = vmul.f32 %v361_v17, %v354_v1  ;;  %v350_v35 = vsub.f32 1.0, %v287_v18  ;;  %v268_v21 = vpop.xlane.xlu0 %267  ;;  %v556_v51 = vpop.eup %555  ;;  %v413_v53 = vsel %vm77_vm10, %v373_v22, 0.0  ;;  %v67_v42 = vmul.f32 %v554_v45, %v906_v39 }
 0x164   :  { %v313_v36 = vpop.xlane.xlu1 %312  ;;  %v374_v41 = vmul.f32 %v367_v25, %v339_v23  ;;  %v286_v27 = vmul.f32 %v548_v15, %v268_v21  ;;  %v362_v46 = vmul.f32 %v348_v33, %v348_v33  ;;  %v558_v56 = vpop.eup %557  ;;  %v342_v4 = vsub.f32 %v321_v37, %v333_v52 }
 0x165   :  { %v322_v44 = vsub.f32 %v313_v36, %v762_v28  ;;  %v375_v10 = vmul.f32 %v368_v32, %v340_v19  ;;  %v364_v47 = vmul.f32 %v350_v35, %v350_v35  ;;  %v560_v49 = vpop.eup %559  ;;  %v337_v8 = vmul.f32 0.6931472, %v558_v56 }
 0x166   :  { %v414_v54 = vsel %vm77_vm10, %v374_v41, 0.0  ;;  %v349_v55 = vsub.f32 1.0, %v286_v27  ;;  %v369_v30 = vmul.f32 %v362_v46, %v355_v59  ;;  %v68_v14 = vsel %vm66_vm11, %v67_v42, %v554_v45 }
 0x167   :  { %v415_v58 = vadd.f32 %v414_v54, %v413_v53  ;;  %v343_v31 = vsub.f32 %v322_v44, %v335_v50  ;;  %v274_v60 = vpop.xlane.xlu0 %273  ;;  %v416_v28 = vsel %vm77_vm10, %v375_v10, 0.0  ;;  %v371_v62 = vmul.f32 %v364_v47, %v357_v16  ;;  %v411_v53 = vld [vmem:[#allocation4] sm:$0x1] }
 0x168   :  { %v316_v61 = vpop.xlane.xlu1 %315  ;;  %v363_v63 = vmul.f32 %v349_v55, %v349_v55  ;;  %v288_v48 = vmul.f32 %v556_v51, %v274_v60  ;;  %v376_v3 = vmul.f32 %v369_v30, %v341_v57  ;;  %v71_v16 = vmul.f32 0.6931472, %v560_v49 }
 0x169   :  { %v417_v1 = vadd.f32 %v416_v28, %v415_v58  ;;  %v323_v24 = vsub.f32 %v316_v61, %v776_v38  ;;  %v378_v26 = vmul.f32 %v371_v62, %v343_v31  ;;  %v74_v18 = vmul.f32 %v68_v14, %v68_v14 }
 0x16a   :  { %v370_v5 = vmul.f32 %v363_v63, %v356_v9  ;;  %v351_v6 = vsub.f32 1.0, %v288_v48  ;;  %v418_v59 = vsel %vm77_vm10, %v376_v3, 0.0  ;;  %v69_v19 = vsel %vm66_vm11, 0.0, %v881_v12 }
 0x16b   :  { %v183_v11 = vpop.xlane.xlu0 %182  ;;  %v419_v39 = vadd.f32 %v418_v59, %v417_v1  ;;  %v344_v13 = vsub.f32 %v323_v24, %v337_v8  ;;  %v422_v23 = vsel %vm77_vm10, %v378_v26, 0.0  ;;  %v72_v2 = vsub.f32 %v69_v19, %v71_v16 }
 0x16c   :  { %v377_v29 = vmul.f32 %v370_v5, %v342_v4  ;;  %v365_v0 = vmul.f32 %v351_v6, %v351_v6  ;;  %v358_v7 = vsub.f32 0.0, %v183_v11 }
 0x16e   :  { %v372_v15 = vmul.f32 %v365_v0, %v358_v7  ;;  %v420_v9 = vsel %vm77_vm10, %v377_v29, 0.0 }
 0x16f   :  { %v59_v38 = vpop.xlane.xlu0 %58  ;;  %v421_v17 = vadd.f32 %v420_v9, %v419_v39 }
 0x170   :  { %v73_v40 = vsub.f32 0.0, %v59_v38  ;;  %v379_v20 = vmul.f32 %v372_v15, %v344_v13 }
 0x171   :  { %v423_v22 = vadd.f32 %v422_v23, %v421_v17 }
 0x172   :  { %v75_v25 = vmul.f32 %v74_v18, %v73_v40  ;;  %v424_v43 = vsel %vm77_vm10, %v379_v20, 0.0 }
 0x173   :  { %v425_v32 = vadd.f32 %v424_v43, %v423_v22 }
 0x174   :  { %v76_v33 = vmul.f32 %v75_v25, %v72_v2 }
 0x175   :  { %426 = vadd.xlane.f32.xlu0 %v425_v32 }
 0x176   :  { %v78_v35 = vsel %vm77_vm10, %v76_v33, 0.0 }
 0x177   :  { %79 = vadd.xlane.f32.xlu1 %v78_v35 }
 0x202   :  { %v427_v21 = vpop.xlane.xlu0 %426 }
 0x203   :  { %v428_v36 = vrot.slane %v427_v21, 4 }
 0x204   :  { %v80_v37 = vpop.xlane.xlu1 %79 }
 0x205   :  { %v429_v41 = vadd.f32 %v428_v36, %v427_v21  ;;  %v81_v12 = vrot.slane %v80_v37, 4 }
 0x207   :  { %v430_v27 = vrot.slane %v429_v41, 2  ;;  %v82_v44 = vadd.f32 %v81_v12, %v80_v37 }
 0x209   :  { %v431_v45 = vadd.f32 %v430_v27, %v429_v41  ;;  %v83_v10 = vrot.slane %v82_v44, 2 }
 0x20b   :  { %v84_v46 = vadd.f32 %v83_v10, %v82_v44  ;;  %v432_v47 = vrot.slane %v431_v45, 1 }
 0x20d   :  { %v85_v50 = vrot.slane %v84_v46, 1  ;;  %v433_v52 = vadd.f32 %v432_v47, %v431_v45 }
 0x20f   :  { %v86_v51 = vadd.f32 %v85_v50, %v84_v46 }
 0x211   :  { %502 = vpush %v86_v51 }
 0x212   :  { %504 = vpush %v433_v52 }
 0x242   :  { %s503_s0 = spop %502 }
 0x243   :  { %v88_v54 = vstv %s503_s0  ;;  %s505_s2 = spop %504 }
 0x244   :  { %89 = vst.msk [vmem:[#allocation2] sm:$0x1] %vm32_vm12, %v88_v54  ;;  %v435_v34 = vstv %s505_s2 }
 0x245   :  { %v436_v55 = vadd.f32 %v435_v34, %v411_v53 }
 0x247   :  { %438 = vst.msk [vmem:[#allocation4] sm:$0x1] %vm32_vm12, %v436_v55 }
 0x24b   :  { %v442_v56 = vld [vmem:[#allocation2] sm:$0x1] }
 0x24c   :  { %v443_v57 = vmul.f32 0.125, %v442_v56 }
 0x24e   :  { %v444_v58 = vld [vmem:[#allocation4] sm:$0x1]  ;;  %446 = vst.msk [vmem:[#allocation2] sm:$0x1] %vm32_vm12, %v443_v57  ;;  %v448_v30 = vmul.f32 0.1, %v443_v57 }
 0x24f   :  { %v445_v31 = vmul.f32 0.017857144, %v444_v58 }
 0x250   :  { %572 = shalt.err (!%p569_p4)
}
 0x251   :  { %s573_s3 = scalar_lea.hbm %s1007_s6, 16 }
 0x252   :  { %p574_p5 = scmp.ne.s32.totalorder %s1007_s6, %s573_s3  ;;  %p577_p6 = scmp.lt.u32.totalorder %s573_s3, %s1007_s6 }
 0x254   :  { %p579_p7 = pnand %p577_p6, %p574_p5 }
 0x256   :  { %582 = shalt.err (!%p579_p7)
}
 0x257   :  { %460 = dma.vmem_to_hbm [thread:$0]  %s458_s16, 16, %s1007_s6, [#allocation3]   ;;  %447 = vst.msk [vmem:[#allocation4] sm:$0x1] %vm32_vm12, %v445_v31  ;;  %v449_v60 = vadd.f32 %v448_v30, %v445_v31 }
 0x258   :  { %s583_s30 = scalar_lea.vmem %s946_s18, 16  ;;  %s587_s9 = scalar_lea.vmem %s946_s18, 32 }
 0x259   :  { %p584_p8 = scmp.ne.s32.totalorder %s946_s18, %s583_s30  ;;  %p588_p9 = scmp.lt.s32.totalorder %s946_s18, %s946_s18 }
 0x25a   :  { %p589_p10 = scmp.lt.s32.totalorder %s587_s9, %s583_s30 }
 0x25c   :  { %p590_p11 = por %p589_p10, %p588_p9 }
 0x25e   :  { %p591_p12 = pnand %p590_p11, %p584_p8 }
 0x260   :  { %594 = shalt.err (!%p591_p12)
}
 0x261   :  { %s595_s12 = scalar_lea.hbm %s1008_s7, 16 }
 0x262   :  { %p596_p13 = scmp.ne.s32.totalorder %s1008_s7, %s595_s12  ;;  %p599_p0 = scmp.lt.u32.totalorder %s595_s12, %s1008_s7 }
 0x264   :  { %p601_p1 = pnand %p599_p0, %p596_p13 }
 0x266   :  { %604 = shalt.err (!%p601_p1)
}
 0x267   :  { %470 = dma.vmem_to_hbm [thread:$0]  %s946_s18, 16, %s1008_s7, [#allocation5]   ;;  %450 = vst.msk [vmem:[#allocation6] sm:$0x1] %vm32_vm12, %v449_v60 }
 0x268   :  { %s605_s2 = scalar_lea.vmem %s962_s20, 16  ;;  %s609_s5 = scalar_lea.vmem %s962_s20, 32 }
 0x269   :  { %p606_p2 = scmp.ne.s32.totalorder %s962_s20, %s605_s2  ;;  %p610_p3 = scmp.lt.s32.totalorder %s962_s20, %s962_s20 }
 0x26a   :  { %p611_p4 = scmp.lt.s32.totalorder %s609_s5, %s605_s2 }
 0x26c   :  { %p612_p5 = por %p611_p4, %p610_p3 }
 0x26e   :  { %p613_p6 = pnand %p612_p5, %p606_p2 }
 0x270   :  { %616 = shalt.err (!%p613_p6)
}
 0x271   :  { %s617_s19 = scalar_lea.hbm %s1009_s8, 16 }
 0x272   :  { %p618_p7 = scmp.ne.s32.totalorder %s1009_s8, %s617_s19  ;;  %p621_p8 = scmp.lt.u32.totalorder %s617_s19, %s1009_s8 }
 0x274   :  { %p623_p9 = pnand %p621_p8, %p618_p7 }
 0x276   :  { %626 = shalt.err (!%p623_p9)
}
 0x277   :  { %480 = dma.vmem_to_hbm [thread:$0]  %s962_s20, 16, %s1009_s8, [#allocation5]  }
 0x278   :  { %627 = dma.done.wait [#allocation3], 16  }
 0x279   :  { %628 = vsyncadd [#allocation3], 4294967280 }
 0x27a   :  { %629 = dma.done.wait [#allocation5], 32  }
 0x27b   :  { %630 = vsyncadd [#allocation5], 4294967264 }
 0x27c   :  { %490 = vsyncpa [#allocation3], 1 }
 0x27d   :  { %491 = vsyncpa [#allocation5], 1 }

</bundles_post_ra>
